<compile_context>
chip_gen: v7x
topology: tpu7x:2x2x1
jax: 0.10.0
libtpu: 0.0.40
codegen_flags: <defaults>
</compile_context>

<pallas_src>
import functools

import jax
import jax.numpy as jnp
from jax.experimental import pallas as pl
from jax.experimental.pallas import tpu as pltpu


def _round_up(v, m):
    return ((v + m - 1) // m) * m


def _vmem_capacity_bytes():
    """Physical VMEM of the current TPU, with a v7x-safe fallback."""
    try:
        info = pltpu.get_tpu_info()
        for name in ("vmem_capacity_bytes", "vmem_size_bytes", "vmem_bytes"):
            v = getattr(info, name, None)
            if v:
                return int(v)
    except Exception:
        pass
    return 64 * 1024 * 1024  # v7x per-TensorCore VMEM (smallest of v5e/v6e/v7x)


def _pick_tiles(b, l, h, x_bytes, w_bytes, budget, tile_rows, tile_chunks):
    """Pick (row_tile, chunk_tile) so the double-buffered blocks fit `budget`."""
    tr = _round_up(min(b, tile_rows), 8)    # rows of x per scale step
    tc = _round_up(min(l, tile_chunks), 8)  # flat chunks (rows of x.reshape(l, b)) per gate step

    def est(tr_, tc_):
        xg = 2 * tc_ * b * x_bytes          # chunk-view x blocks (double buffered)
        w1 = 2 * tc_ * h * w_bytes          # W1 slab blocks
        xs = 2 * tr_ * l * x_bytes          # scale-view x blocks
        oo = 2 * tr_ * l * x_bytes          # output blocks
        w2 = 2 * h * l * w_bytes            # resident W2 (counted double-buffered)
        scr = 8 * (h + l) * 4               # h_acc + gate scratch (sublane padded)
        tmp = tc_ * (h + b) * 4             # f32 compute temporaries in the gate step
        return xg + w1 + xs + oo + w2 + scr + tmp + (2 << 20)

    while est(tr, tc) > budget and (tr > 8 or tc > 8):
        scale_cost = tr * l * x_bytes
        gate_cost = tc * (b * x_bytes + h * w_bytes)
        if tr > 8 and (scale_cost >= gate_cost or tc <= 8):
            tr = _round_up(max(8, tr // 2), 8)
        else:
            tc = _round_up(max(8, tc // 2), 8)
    return tr, tc


def _se_fused_kernel(xg_ref, w1_ref, w2_ref, x_ref, o_ref, h_acc, gate,
                     *, l, n_gate, n_scale, tile_c):
    phase = pl.program_id(0)
    j = pl.program_id(1)

    # ---- phase 0: gate reduction over flat-chunk tiles ----------------------
    @pl.when(jnp.logical_and(phase == 0, j < n_gate))
    def _gate_step():
        @pl.when(j == 0)
        def _init():
            h_acc[...] = jnp.zeros_like(h_acc)

        # y tile: one lane-max per flat b-wide chunk (rows of the (l, b) view).
        cmax = jnp.max(xg_ref[...], axis=-1, keepdims=True).astype(jnp.float32)
        contrib = cmax * w1_ref[...].astype(jnp.float32)            # (tile_c, h) f32
        if l % tile_c:                                               # ragged last tile
            row = jax.lax.broadcasted_iota(jnp.int32, cmax.shape, 0) + j * tile_c
            contrib = jnp.where(row < l, contrib, 0.0)
        h_acc[...] += jnp.sum(contrib, axis=0, keepdims=True)       # (1, h)

        @pl.when(j == n_gate - 1)
        def _finalize():
            hidden = jnp.maximum(h_acc[...], 0.0)                                # ReLU
            s = jnp.dot(hidden, w2_ref[...].astype(jnp.float32),
                        preferred_element_type=jnp.float32)                      # (1, l)
            gate[...] = jax.nn.sigmoid(s)                                        # Sigmoid

    # ---- phase 1: out = x * gate over lane-dense row tiles ------------------
    @pl.when(jnp.logical_and(phase == 1, j < n_scale))
    def _scale_step():
        g = gate[...].astype(x_ref.dtype)   # keep bf16 inputs on the bf16 path
        o_ref[...] = (x_ref[...] * g).astype(o_ref.dtype)


def se_layer(x, w1, w2, *, tile_rows=1024, tile_chunks=2048):
    """SELayer forward.

    x : (b, l)      input (PyTorch layout)
    w1: (l, l//2)   first Linear weight, pre-transposed   (hidden = y @ w1)
    w2: (l//2, l)   second Linear weight, pre-transposed  (score  = hidden @ w2)
    """
    assert x.ndim == 2
    b, l = x.shape
    h = w1.shape[1]
    assert w1.shape == (l, h) and w2.shape == (h, l)

    budget = int(_vmem_capacity_bytes() * 0.8)
    tile_r, tile_c = _pick_tiles(b, l, h, x.dtype.itemsize, w1.dtype.itemsize,
                                 budget, tile_rows, tile_chunks)

    n_gate = pl.cdiv(l, tile_c)    # gate-reduction steps (flat-chunk tiles)
    n_scale = pl.cdiv(b, tile_r)   # scale steps (row tiles)
    nt = max(n_gate, n_scale)

    # Flat chunk view of x: row c of xg is the c-th b-sized chunk of row-major x.
    # Pure reshape of a contiguous array -> XLA bitcast (no copy, no transpose).
    xg = x.reshape(l, b)

    kernel = functools.partial(_se_fused_kernel, l=l, n_gate=n_gate,
                               n_scale=n_scale, tile_c=tile_c)

    return pl.pallas_call(
        kernel,
        out_shape=jax.ShapeDtypeStruct((b, l), x.dtype),
        grid=(2, nt),
        in_specs=[
            # Gate-phase inputs: walk chunk tiles in phase 0, then park on the
            # last tile in phase 1 (no re-fetch after the phase switch).
            pl.BlockSpec((tile_c, b),
                         lambda p, j: (jnp.minimum(j + p * n_gate, n_gate - 1), 0)),
            pl.BlockSpec((tile_c, h),
                         lambda p, j: (jnp.minimum(j + p * n_gate, n_gate - 1), 0)),
            pl.BlockSpec((h, l), lambda p, j: (0, 0)),                 # W2 resident
            # Scale-phase input: parked on tile 0 during phase 0, walks in phase 1
            # (the phase-0 fetch of tile 0 is reused by the first scale step).
            pl.BlockSpec((tile_r, l),
                         lambda p, j: (p * jnp.minimum(j, n_scale - 1), 0)),
        ],
        out_specs=pl.BlockSpec((tile_r, l),
                               lambda p, j: (p * jnp.minimum(j, n_scale - 1), 0)),
        scratch_shapes=[
            pltpu.VMEM((1, h), jnp.float32),   # f32 h accumulator
            pltpu.VMEM((1, l), jnp.float32),   # gate (never leaves VMEM)
        ],
        compiler_params=pltpu.CompilerParams(
            # Both axes carry state (h accumulation; gate -> scale dependency).
            dimension_semantics=("arbitrary", "arbitrary"),
            vmem_limit_bytes=budget),
    )(xg, w1, w2, x)


def se_layer_ref(x, w1, w2):
    b, l = x.shape
    y = jnp.max(x.reshape(l, b), axis=-1)[None, :]          # (1, l)
    hh = jnp.maximum(y @ w1, 0.0)
    g = jax.nn.sigmoid(hh @ w2)
    return x * g


if __name__ == "__main__":
    key = jax.random.PRNGKey(0)
    kx, k1, k2 = jax.random.split(key, 3)

    # Main case: b=16 rows, in_channel l=128, hidden h=64 (weights pre-transposed).
    B, L = 16, 128
    H = L // 2
    x = jax.random.normal(kx, (B, L), dtype=jnp.float32)
    w1 = jax.random.normal(k1, (L, H), dtype=jnp.float32) * (1.0 / jnp.sqrt(L))
    w2 = jax.random.normal(k2, (H, L), dtype=jnp.float32) * (1.0 / jnp.sqrt(H))
    ref = se_layer_ref(x, w1, w2)

    # 1) Default (device-derived) tiling: single gate tile + single scale tile.
    out = jax.block_until_ready(se_layer(x, w1, w2))
    assert out.shape == (B, L) and out.dtype == x.dtype
    assert jnp.allclose(out, ref, atol=1e-5, rtol=1e-5)

    # 2) Forced small tiles: multi-step gate accumulation, ragged gate tile,
    #    and phase-index clamping (n_gate != n_scale).
    out2 = jax.block_until_ready(se_layer(x, w1, w2, tile_rows=8, tile_chunks=48))
    assert jnp.allclose(out2, ref, atol=1e-5, rtol=1e-5)

    # 3) Ragged shapes (l not a multiple of b, b not a multiple of 8) — the old
    #    l % b == 0 restriction is gone.
    B3, L3 = 12, 104
    H3 = L3 // 2
    x3 = jax.random.normal(kx, (B3, L3), dtype=jnp.float32)
    w13 = jax.random.normal(k1, (L3, H3), dtype=jnp.float32) * (1.0 / jnp.sqrt(L3))
    w23 = jax.random.normal(k2, (H3, L3), dtype=jnp.float32) * (1.0 / jnp.sqrt(H3))
    out3 = jax.block_until_ready(se_layer(x3, w13, w23, tile_rows=8, tile_chunks=64))
    ref3 = se_layer_ref(x3, w13, w23)
    assert jnp.allclose(out3, ref3, atol=1e-5, rtol=1e-5)

    print("KERNEL_OK")
</pallas_src>

<mosaic_0001>
module attributes {stable_mosaic.version = 11 : i64} {
  func.func @_se_fused_kernel(%arg0: i32, %arg1: i32, %arg2: memref<128x16xf32, #tpu.memory_space<vmem>>, %arg3: memref<128x64xf32, #tpu.memory_space<vmem>>, %arg4: memref<64x128xf32, #tpu.memory_space<vmem>>, %arg5: memref<16x128xf32, #tpu.memory_space<vmem>>, %arg6: memref<16x128xf32, #tpu.memory_space<vmem>>, %arg7: memref<1x64xf32, #tpu.memory_space<vmem>>, %arg8: memref<1x128xf32, #tpu.memory_space<vmem>>) attributes {dimension_semantics = [#tpu.dimension_semantics<arbitrary>, #tpu.dimension_semantics<arbitrary>], iteration_bounds = array<i64: 2, 1>, scalar_prefetch = 0 : i64, scratch_operands = 2 : i64, tpu.core_type = #tpu.core_type<tc>, window_params = [{transform_indices = @transform_0, window_bounds = array<i64: 128, 16>}, {transform_indices = @transform_1, window_bounds = array<i64: 128, 64>}, {pipeline_mode = #tpu.pipeline_mode<synchronous>, transform_indices = @transform_2, window_bounds = array<i64: 64, 128>}, {transform_indices = @transform_3, window_bounds = array<i64: 16, 128>}, {transform_indices = @transform_4, window_bounds = array<i64: 16, 128>}]} {
    %c0_i32 = arith.constant 0 : i32
    %0 = arith.cmpi eq, %arg0, %c0_i32 : i32
    %c1_i32 = arith.constant 1 : i32
    %1 = arith.cmpi slt, %arg1, %c1_i32 : i32
    %2 = arith.andi %0, %1 : i1
    %3 = arith.extui %2 : i1 to i32
    %c0_i32_0 = arith.constant 0 : i32
    %4 = arith.cmpi ne, %3, %c0_i32_0 : i32
    scf.if %4 {
      %c0_i32_4 = arith.constant 0 : i32
      %10 = arith.cmpi eq, %arg1, %c0_i32_4 : i32
      %11 = arith.extui %10 : i1 to i32
      %c0_i32_5 = arith.constant 0 : i32
      %12 = arith.cmpi ne, %11, %c0_i32_5 : i32
      scf.if %12 {
        %cst_16 = arith.constant 0.000000e+00 : f32
        %27 = vector.broadcast %cst_16 : f32 to vector<1x64xf32>
        %c0_17 = arith.constant 0 : index
        %c0_18 = arith.constant 0 : index
        %28 = vector.load %arg7[%c0_17, %c0_18] : memref<1x64xf32, #tpu.memory_space<vmem>>, vector<1x64xf32>
        tpu.vector_store %arg7[%c0_17, %c0_18], %27 {strides = array<i32>} : memref<1x64xf32, #tpu.memory_space<vmem>>, vector<1x64xf32>,
      } else {
      }
      %c0 = arith.constant 0 : index
      %c0_6 = arith.constant 0 : index
      %13 = vector.load %arg2[%c0, %c0_6] : memref<128x16xf32, #tpu.memory_space<vmem>>, vector<128x16xf32>
      %cst = arith.constant dense<0xFF800000> : vector<128xf32>
      %14 = vector.multi_reduction <maximumf>, %13, %cst [1] : vector<128x16xf32> to vector<128xf32>
      %15 = vector.shape_cast %14 : vector<128xf32> to vector<128x1xf32>
      %c0_7 = arith.constant 0 : index
      %c0_8 = arith.constant 0 : index
      %16 = vector.load %arg3[%c0_7, %c0_8] : memref<128x64xf32, #tpu.memory_space<vmem>>, vector<128x64xf32>
      %17 = vector.broadcast %15 : vector<128x1xf32> to vector<128x64xf32>
      %18 = arith.mulf %17, %16 : vector<128x64xf32>
      %c0_9 = arith.constant 0 : index
      %c0_10 = arith.constant 0 : index
      %19 = vector.load %arg7[%c0_9, %c0_10] : memref<1x64xf32, #tpu.memory_space<vmem>>, vector<1x64xf32>
      %cst_11 = arith.constant dense<0.000000e+00> : vector<64xf32>
      %20 = vector.multi_reduction <add>, %18, %cst_11 [0] : vector<128x64xf32> to vector<64xf32>
      %21 = vector.shape_cast %20 : vector<64xf32> to vector<1x64xf32>
      %22 = arith.addf %19, %21 : vector<1x64xf32>
      %c0_12 = arith.constant 0 : index
      %c0_13 = arith.constant 0 : index
      %23 = vector.load %arg7[%c0_12, %c0_13] : memref<1x64xf32, #tpu.memory_space<vmem>>, vector<1x64xf32>
      tpu.vector_store %arg7[%c0_12, %c0_13], %22 {strides = array<i32>} : memref<1x64xf32, #tpu.memory_space<vmem>>, vector<1x64xf32>,
      %c0_i32_14 = arith.constant 0 : i32
      %24 = arith.cmpi eq, %arg1, %c0_i32_14 : i32
      %25 = arith.extui %24 : i1 to i32
      %c0_i32_15 = arith.constant 0 : i32
      %26 = arith.cmpi ne, %25, %c0_i32_15 : i32
      scf.if %26 {
        %c0_16 = arith.constant 0 : index
        %c0_17 = arith.constant 0 : index
        %27 = vector.load %arg7[%c0_16, %c0_17] : memref<1x64xf32, #tpu.memory_space<vmem>>, vector<1x64xf32>
        %cst_18 = arith.constant 0.000000e+00 : f32
        %28 = vector.broadcast %cst_18 : f32 to vector<1x64xf32>
        %29 = arith.maximumf %27, %28 : vector<1x64xf32>
        %c0_19 = arith.constant 0 : index
        %c0_20 = arith.constant 0 : index
        %30 = vector.load %arg4[%c0_19, %c0_20] : memref<64x128xf32, #tpu.memory_space<vmem>>, vector<64x128xf32>
        %cst_21 = arith.constant dense<0.000000e+00> : vector<1x128xf32>
        %31 = tpu.matmul %29, %30, %cst_21 {dimension_numbers = #tpu.dot_dimension_numbers<[1], [0], [0], [1], [0, 0, 1, 1], [], []>} : vector<1x64xf32>, vector<64x128xf32>, vector<1x128xf32> -> vector<1x128xf32>
        %32 = arith.negf %31 : vector<1x128xf32>
        %33 = math.exp %32 : vector<1x128xf32>
        %cst_22 = arith.constant 1.000000e+00 : f32
        %34 = vector.broadcast %cst_22 : f32 to vector<1x128xf32>
        %35 = arith.addf %34, %33 : vector<1x128xf32>
        %36 = arith.divf %34, %35 : vector<1x128xf32>
        %c0_23 = arith.constant 0 : index
        %c0_24 = arith.constant 0 : index
        %37 = vector.load %arg8[%c0_23, %c0_24] : memref<1x128xf32, #tpu.memory_space<vmem>>, vector<1x128xf32>
        tpu.vector_store %arg8[%c0_23, %c0_24], %36 {strides = array<i32>} : memref<1x128xf32, #tpu.memory_space<vmem>>, vector<1x128xf32>,
      } else {
      }
    } else {
    }
    %c1_i32_1 = arith.constant 1 : i32
    %5 = arith.cmpi eq, %arg0, %c1_i32_1 : i32
    %c1_i32_2 = arith.constant 1 : i32
    %6 = arith.cmpi slt, %arg1, %c1_i32_2 : i32
    %7 = arith.andi %5, %6 : i1
    %8 = arith.extui %7 : i1 to i32
    %c0_i32_3 = arith.constant 0 : i32
    %9 = arith.cmpi ne, %8, %c0_i32_3 : i32
    scf.if %9 {
      %c0 = arith.constant 0 : index
      %c0_4 = arith.constant 0 : index
      %10 = vector.load %arg8[%c0, %c0_4] : memref<1x128xf32, #tpu.memory_space<vmem>>, vector<1x128xf32>
      %c0_5 = arith.constant 0 : index
      %c0_6 = arith.constant 0 : index
      %11 = vector.load %arg5[%c0_5, %c0_6] : memref<16x128xf32, #tpu.memory_space<vmem>>, vector<16x128xf32>
      %12 = vector.broadcast %10 : vector<1x128xf32> to vector<16x128xf32>
      %13 = arith.mulf %11, %12 : vector<16x128xf32>
      %c0_7 = arith.constant 0 : index
      %c0_8 = arith.constant 0 : index
      %14 = vector.load %arg6[%c0_7, %c0_8] : memref<16x128xf32, #tpu.memory_space<vmem>>, vector<16x128xf32>
      tpu.vector_store %arg6[%c0_7, %c0_8], %13 {strides = array<i32>} : memref<16x128xf32, #tpu.memory_space<vmem>>, vector<16x128xf32>,
    } else {
    }
    return
  }
  func.func @transform_0(%arg0: i32, %arg1: i32) -> (i32, i32) {
    %c1_i32 = arith.constant 1 : i32
    %0 = arith.muli %arg0, %c1_i32 : i32
    %1 = arith.addi %arg1, %0 : i32
    %c0_i32 = arith.constant 0 : i32
    %2 = arith.minsi %1, %c0_i32 : i32
    %c0_i32_0 = arith.constant 0 : i32
    %c0_i32_1 = arith.constant 0 : i32
    return %2, %c0_i32_0 : i32, i32
  }
  func.func @transform_1(%arg0: i32, %arg1: i32) -> (i32, i32) {
    %c1_i32 = arith.constant 1 : i32
    %0 = arith.muli %arg0, %c1_i32 : i32
    %1 = arith.addi %arg1, %0 : i32
    %c0_i32 = arith.constant 0 : i32
    %2 = arith.minsi %1, %c0_i32 : i32
    %c0_i32_0 = arith.constant 0 : i32
    %c0_i32_1 = arith.constant 0 : i32
    return %2, %c0_i32_0 : i32, i32
  }
  func.func @transform_2(%arg0: i32, %arg1: i32) -> (i32, i32) {
    %c0_i32 = arith.constant 0 : i32
    %c0_i32_0 = arith.constant 0 : i32
    %c0_i32_1 = arith.constant 0 : i32
    return %c0_i32, %c0_i32_0 : i32, i32
  }
  func.func @transform_3(%arg0: i32, %arg1: i32) -> (i32, i32) {
    %c0_i32 = arith.constant 0 : i32
    %0 = arith.minsi %arg1, %c0_i32 : i32
    %1 = arith.muli %arg0, %0 : i32
    %c0_i32_0 = arith.constant 0 : i32
    %c0_i32_1 = arith.constant 0 : i32
    return %1, %c0_i32_0 : i32, i32
  }
  func.func @transform_4(%arg0: i32, %arg1: i32) -> (i32, i32) {
    %c0_i32 = arith.constant 0 : i32
    %0 = arith.minsi %arg1, %c0_i32 : i32
    %1 = arith.muli %arg0, %0 : i32
    %c0_i32_0 = arith.constant 0 : i32
    %c0_i32_1 = arith.constant 0 : i32
    return %1, %c0_i32_0 : i32, i32
  }
}

</mosaic_0001>

<bundles_post_ra>
// kernel: tpu_custom_call.1
= control target key start
LH: loop header
LB: loop body
LE: loop exit
PB: predicated region body
PF: predicated region fallthrough
CT: control target
= control target key end

     0   :  { %9 = vsyncpa [#allocation5], 0  ;;  %s1060_s0 = inlined_call_operand.vmem [shape: f32[128,16], index: 0, kind: input, shape index: {}]   ;;  %s1061_s1 = inlined_call_operand.vmem [shape: f32[128,64], index: 1, kind: input, shape index: {}]   ;;  %s1062_s2 = inlined_call_operand.vmem [shape: f32[64,128], index: 2, kind: input, shape index: {}]   ;;  %s1063_s3 = inlined_call_operand.vmem [shape: f32[16,128], index: 3, kind: input, shape index: {}]   ;;  %s1064_s4 = inlined_call_operand.hbm [shape: f32[16,128], index: 4, kind: output, shape index: {}]  }
   0x1   :  { %11 = vsyncpa [#allocation5 + $0x1], 0  ;;  %s891_s15 = smov 0   ;;  %s893_s16 = smov 0  }
   0x2   :  { %s895_s17 = smov 0  }
   0x3 LB: > { %s700_s18 = sadd.s32 4294967295, %s858_s17   ;;  %s701_s19 = sadd.s32 4294967294, %s858_s17   ;;  %s858_s17 = sphi %s895_s17, %s17_s17   ;;  %s854_s16 = sphi %s893_s16, %s1067_s16   ;;  %s850_s15 = sphi %s891_s15, %s1066_s15  }
   0x4   : > { %s29_s20 = sadd.s32 1, %s854_s16  ;;  %p705_p0 = scmp.ge.s32.totalorder %s858_s17, 1 }
   0x5   : > { %p31_p1 = scmp.ge.s32.totalorder %s29_s20, 2  ;;  %p242_p2 = scmp.lt.s32.totalorder %s858_s17, 3 }
   0x7   : > { %s1069_s20 = smov (%p31_p1, %s29_s20), 0  ;;  %p243_p3 = pnand %p705_p0, %p242_p2 }
   0x8   : > { %p288_p4 = scmp.lt.s32.totalorder (!%p243_p3), %s850_s15, 0  ;;  %p327_p5 = scmp.eq.s32.totalorder (!%p243_p3), %s850_s15, 0 }
   0x9   : > { %246 = sbr.rel (%p243_p3) target bundleno = 502 (0x1f6), region = 36 }
  0x10   : > { %s289_s21 = scalar_select %p288_p4, %s850_s15, 0 }
  0x11   : > { %332 = sbr.rel (!%p327_p5) target bundleno = 468 (0x1d4), region = 40  ;;  %vm355_vm0 = vcmask (%p327_p5), 130048   ;;  %vm337_vm1 = vcmask (%p327_p5), 516096   ;;  %v860_v32 = vmov (%p327_p5), 0.0   ;;  %v483_v33 = vld [vmem:[%s1062_s2] sm:$0xff] (%p327_p5)  ;;  %v484_v34 = vld [vmem:[%s1062_s2 + $0x8] sm:$0xff] (%p327_p5) }
  0x12   : > { %s706_s22 = sshll.u32 %s289_s21, 4  ;;  %338 = vst.msk [vmem:[#allocation2] sm:$0x1] (%p327_p5), %vm337_vm1, %v860_v32  ;;  %v750_v35 = vpack.c.bf16 (%p327_p5), %v484_v34, %v483_v33  ;;  %v861_v36 = vmov (%p327_p5), 0.0|0.0   ;;  %v485_v37 = vld [vmem:[%s1062_s2 + $0x10] sm:$0xff] (%p327_p5)  ;;  %v486_v38 = vld [vmem:[%s1062_s2 + $0x18] sm:$0xff] (%p327_p5) }
  0x13   : > { %p291_p6 = scmp.lt.s32.totalorder %s706_s22, 15  ;;  %749 = vmatprep.subr.bf16.mxu0 (%p327_p5), %v861_v36  ;;  %v487_v39 = vld [vmem:[%s1062_s2 + $0x20] sm:$0xff] (%p327_p5)  ;;  %v753_v40 = vpack.c.bf16 (%p327_p5), %v486_v38, %v485_v37  ;;  %v488_v41 = vld [vmem:[%s1062_s2 + $0x28] sm:$0xff] (%p327_p5)  ;;  %v489_v43 = vld [vmem:[%s1062_s2 + $0x30] sm:$0xff] (%p327_p5)  ;;  %vm862_vm2 = vmmov (%p327_p5), 0   ;;  %vm437_vm3 = vcmask (%p327_p5), 523264  }
  0x14   : > { %751 = vmatpush3.bf16.msra.mxu0 (%p327_p5), %v750_v35  ;;  %v756_v42 = vpack.c.bf16 (%p327_p5), %v488_v41, %v487_v39  ;;  %v490_v44 = vld [vmem:[%s1062_s2 + $0x38] sm:$0xff] (%p327_p5)  ;;  %746 = vmatprep.mubr.msk.f32.mxu0 (%p327_p5), %vm862_vm2, %v860_v32 }
  0x15   : > { %s1071_s22 = smov (!%p291_p6, %s706_s22), 15  ;;  %752 = vmatprep.subr.bf16.mxu0 (%p327_p5), %v861_v36  ;;  %v759_v45 = vpack.c.bf16 (%p327_p5), %v490_v44, %v489_v43 }
  0x16   : > { %s707_s23 = sshll.u32 %s1071_s22, 3 }
  0x17   : > { %s919_s26 = scalar_lea.vmem %s1060_s0, %s707_s23  ;;  %s924_s29 = scalar_lea.vmem %s1061_s1, %s707_s23 }
  0x18   : > { %v339_v0 = vld [vmem:[%s919_s26] sm:$0xff]  ;;  %v341_v1 = vld [vmem:[%s919_s26 + $0x10] sm:$0xff]  ;;  %v340_v2 = vld [vmem:[%s919_s26 + $0x8] sm:$0xff]  ;;  %754 = vmatpush3.bf16.msra.mxu0 %v753_v40 }
  0x19   : > { %v356_v3 = vsel %vm355_vm0, %v339_v0, -inf  ;;  %v362_v4 = vsel %vm355_vm0, %v341_v1, -inf  ;;  %v342_v5 = vld [vmem:[%s919_s26 + $0x18] sm:$0xff]  ;;  %v359_v6 = vsel %vm355_vm0, %v340_v2, -inf  ;;  %v343_v8 = vld [vmem:[%s919_s26 + $0x20] sm:$0xff]  ;;  %v344_v9 = vld [vmem:[%s919_s26 + $0x28] sm:$0xff]  ;;  %755 = vmatprep.subr.bf16.mxu0 %v861_v36 }
  0x1a   : > { %357 = vmax.xlane.f32.xlu0 %v356_v3  ;;  %363 = vmax.xlane.f32.xlu1 %v362_v4  ;;  %v365_v7 = vsel %vm355_vm0, %v342_v5, -inf  ;;  %v368_v10 = vsel %vm355_vm0, %v343_v8, -inf  ;;  %v371_v11 = vsel %vm355_vm0, %v344_v9, -inf  ;;  %v345_v12 = vld [vmem:[%s919_s26 + $0x30] sm:$0xff]  ;;  %v346_v13 = vld [vmem:[%s919_s26 + $0x38] sm:$0xff]  ;;  %v347_v16 = vld [vmem:[%s919_s26 + $0x40] sm:$0xff] }
  0x1b   : > { %v374_v14 = vsel %vm355_vm0, %v345_v12, -inf  ;;  %v377_v15 = vsel %vm355_vm0, %v346_v13, -inf  ;;  %v348_v17 = vld [vmem:[%s919_s26 + $0x48] sm:$0xff]  ;;  %v380_v18 = vsel %vm355_vm0, %v347_v16, -inf  ;;  %v349_v20 = vld [vmem:[%s919_s26 + $0x50] sm:$0xff]  ;;  %v350_v21 = vld [vmem:[%s919_s26 + $0x58] sm:$0xff] }
  0x1c   : > { %v383_v19 = vsel %vm355_vm0, %v348_v17, -inf  ;;  %v386_v22 = vsel %vm355_vm0, %v349_v20, -inf  ;;  %v389_v23 = vsel %vm355_vm0, %v350_v21, -inf  ;;  %v351_v24 = vld [vmem:[%s919_s26 + $0x60] sm:$0xff]  ;;  %v352_v25 = vld [vmem:[%s919_s26 + $0x68] sm:$0xff]  ;;  %v353_v28 = vld [vmem:[%s919_s26 + $0x70] sm:$0xff]  ;;  %757 = vmatpush3.bf16.msra.mxu0 %v756_v42 }
  0x1d   : > { %v392_v26 = vsel %vm355_vm0, %v351_v24, -inf  ;;  %v395_v27 = vsel %vm355_vm0, %v352_v25, -inf  ;;  %v354_v29 = vld [vmem:[%s919_s26 + $0x78] sm:$0xff]  ;;  %v398_v30 = vsel %vm355_vm0, %v353_v28, -inf  ;;  %758 = vmatprep.subr.bf16.mxu0 %v861_v36  ;;  %v404_v46 = vld [vmem:[%s924_s29] sm:$0xff]  ;;  %v406_v49 = vld [vmem:[%s924_s29 + $0x10] sm:$0xff] }
  0x1e   : > { %360 = vmax.xlane.f32.xlu0 %v359_v6  ;;  %366 = vmax.xlane.f32.xlu1 %v365_v7  ;;  %v401_v31 = vsel %vm355_vm0, %v354_v29, -inf  ;;  %v405_v50 = vld [vmem:[%s924_s29 + $0x8] sm:$0xff]  ;;  %v407_v51 = vld [vmem:[%s924_s29 + $0x18] sm:$0xff]  ;;  %v408_v58 = vld [vmem:[%s924_s29 + $0x20] sm:$0xff] }
  0x1f   : > { %v409_v59 = vld [vmem:[%s924_s29 + $0x28] sm:$0xff]  ;;  %v410_v6 = vld [vmem:[%s924_s29 + $0x30] sm:$0xff]  ;;  %v411_v7 = vld [vmem:[%s924_s29 + $0x38] sm:$0xff] }
  0x20   : > { %760 = vmatpush3.bf16.msra.mxu0 %v759_v45  ;;  %v412_v16 = vld [vmem:[%s924_s29 + $0x40] sm:$0xff]  ;;  %v413_v17 = vld [vmem:[%s924_s29 + $0x48] sm:$0xff] }
  0x21   : > { %v416_v36 = vld [vmem:[%s924_s29 + $0x60] sm:$0xff]  ;;  %v417_v37 = vld [vmem:[%s924_s29 + $0x68] sm:$0xff] }
  0x22   : > { %369 = vmax.xlane.f32.xlu0 %v368_v10  ;;  %372 = vmax.xlane.f32.xlu1 %v371_v11 }
  0x26   : > { %375 = vmax.xlane.f32.xlu0 %v374_v14  ;;  %378 = vmax.xlane.f32.xlu1 %v377_v15 }
  0x2a   : > { %381 = vmax.xlane.f32.xlu0 %v380_v18  ;;  %384 = vmax.xlane.f32.xlu1 %v383_v19 }
  0x2e   : > { %387 = vmax.xlane.f32.xlu0 %v386_v22  ;;  %390 = vmax.xlane.f32.xlu1 %v389_v23 }
  0x32   : > { %393 = vmax.xlane.f32.xlu0 %v392_v26  ;;  %396 = vmax.xlane.f32.xlu1 %v395_v27  ;;  %v414_v26 = vld [vmem:[%s924_s29 + $0x50] sm:$0xff]  ;;  %v415_v27 = vld [vmem:[%s924_s29 + $0x58] sm:$0xff] }
  0x36   : > { %399 = vmax.xlane.f32.xlu0 %v398_v30  ;;  %402 = vmax.xlane.f32.xlu1 %v401_v31 }
  0xa7   : > { %v358_v47 = vpop.xlane.xlu0 %357  ;;  %v364_v48 = vpop.xlane.xlu1 %363 }
  0xa8   : > { %v420_v52 = vmul.f32 %v404_v46, %v358_v47  ;;  %v422_v55 = vmul.f32 %v406_v49, %v364_v48  ;;  %v418_v46 = vld [vmem:[%s924_s29 + $0x70] sm:$0xff]  ;;  %v419_v47 = vld [vmem:[%s924_s29 + $0x78] sm:$0xff] }
  0xaa   : > { %v438_v60 = vsel %vm437_vm3, %v420_v52, 0.0  ;;  %v441_v1 = vsel %vm437_vm3, %v422_v55, 0.0 }
  0xab   : > { %v361_v53 = vpop.xlane.xlu0 %360  ;;  %v367_v54 = vpop.xlane.xlu1 %366 }
  0xac   : > { %v421_v56 = vmul.f32 %v405_v50, %v361_v53  ;;  %v423_v57 = vmul.f32 %v407_v51, %v367_v54 }
  0xae   : > { %v439_v61 = vsel %vm437_vm3, %v421_v56, 0.0  ;;  %v443_v2 = vsel %vm437_vm3, %v423_v57, 0.0 }
  0xaf   : > { %v440_v62 = vadd.f32 %v439_v61, %v438_v60  ;;  %v370_v63 = vpop.xlane.xlu0 %369  ;;  %v373_v0 = vpop.xlane.xlu1 %372 }
  0xb0   : > { %v424_v3 = vmul.f32 %v408_v58, %v370_v63  ;;  %v425_v4 = vmul.f32 %v409_v59, %v373_v0 }
  0xb1   : > { %v442_v5 = vadd.f32 %v441_v1, %v440_v62 }
  0xb2   : > { %v445_v8 = vsel %vm437_vm3, %v424_v3, 0.0  ;;  %v447_v12 = vsel %vm437_vm3, %v425_v4, 0.0 }
  0xb3   : > { %v444_v9 = vadd.f32 %v443_v2, %v442_v5  ;;  %v376_v10 = vpop.xlane.xlu0 %375  ;;  %v379_v11 = vpop.xlane.xlu1 %378  ;;  %v436_v2 = vld [vmem:[#allocation2] sm:$0x1] }
  0xb4   : > { %v426_v13 = vmul.f32 %v410_v6, %v376_v10  ;;  %v427_v14 = vmul.f32 %v411_v7, %v379_v11 }
  0xb5   : > { %v446_v15 = vadd.f32 %v445_v8, %v444_v9 }
  0xb6   : > { %v449_v18 = vsel %vm437_vm3, %v426_v13, 0.0  ;;  %v451_v22 = vsel %vm437_vm3, %v427_v14, 0.0 }
  0xb7   : > { %v448_v19 = vadd.f32 %v447_v12, %v446_v15  ;;  %v382_v20 = vpop.xlane.xlu0 %381  ;;  %v385_v21 = vpop.xlane.xlu1 %384 }
  0xb8   : > { %v428_v23 = vmul.f32 %v412_v16, %v382_v20  ;;  %v429_v24 = vmul.f32 %v413_v17, %v385_v21 }
  0xb9   : > { %v450_v25 = vadd.f32 %v449_v18, %v448_v19 }
  0xba   : > { %v453_v28 = vsel %vm437_vm3, %v428_v23, 0.0  ;;  %v455_v32 = vsel %vm437_vm3, %v429_v24, 0.0 }
  0xbb   : > { %v452_v29 = vadd.f32 %v451_v22, %v450_v25  ;;  %v388_v30 = vpop.xlane.xlu0 %387  ;;  %v391_v31 = vpop.xlane.xlu1 %390 }
  0xbc   : > { %v430_v33 = vmul.f32 %v414_v26, %v388_v30  ;;  %v431_v34 = vmul.f32 %v415_v27, %v391_v31 }
  0xbd   : > { %v454_v35 = vadd.f32 %v453_v28, %v452_v29 }
  0xbe   : > { %v457_v38 = vsel %vm437_vm3, %v430_v33, 0.0  ;;  %v459_v42 = vsel %vm437_vm3, %v431_v34, 0.0 }
  0xbf   : > { %v456_v39 = vadd.f32 %v455_v32, %v454_v35  ;;  %v394_v40 = vpop.xlane.xlu0 %393  ;;  %v397_v41 = vpop.xlane.xlu1 %396 }
  0xc0   : > { %v432_v43 = vmul.f32 %v416_v36, %v394_v40  ;;  %v433_v44 = vmul.f32 %v417_v37, %v397_v41 }
  0xc1   : > { %v458_v45 = vadd.f32 %v457_v38, %v456_v39 }
  0xc2   : > { %v461_v48 = vsel %vm437_vm3, %v432_v43, 0.0  ;;  %v463_v52 = vsel %vm437_vm3, %v433_v44, 0.0 }
  0xc3   : > { %v460_v49 = vadd.f32 %v459_v42, %v458_v45  ;;  %v400_v50 = vpop.xlane.xlu0 %399  ;;  %v403_v51 = vpop.xlane.xlu1 %402 }
  0xc4   : > { %v434_v53 = vmul.f32 %v418_v46, %v400_v50  ;;  %v435_v54 = vmul.f32 %v419_v47, %v403_v51 }
  0xc5   : > { %v462_v55 = vadd.f32 %v461_v48, %v460_v49 }
  0xc6   : > { %v465_v56 = vsel %vm437_vm3, %v434_v53, 0.0  ;;  %v467_v58 = vsel %vm437_vm3, %v435_v54, 0.0 }
  0xc7   : > { %v464_v57 = vadd.f32 %v463_v52, %v462_v55 }
  0xc9   : > { %v466_v59 = vadd.f32 %v465_v56, %v464_v57 }
  0xcb   : > { %v468_v60 = vadd.f32 %v467_v58, %v466_v59 }
  0xcd   : > { %v469_v61 = vrot.slane %v468_v60, 4 }
  0xcf   : > { %v470_v62 = vadd.f32 %v469_v61, %v468_v60 }
  0xd1   : > { %v471_v63 = vrot.slane %v470_v62, 2 }
  0xd3   : > { %v472_v0 = vadd.f32 %v471_v63, %v470_v62 }
  0xd5   : > { %v473_v1 = vrot.slane %v472_v0, 1 }
  0xd7   : > { %v474_v3 = vadd.f32 %v473_v1, %v472_v0 }
  0xd9   : > { %v475_v4 = vadd.f32 %v474_v3, %v436_v2 }
  0xdb   : > { %477 = vst.msk [vmem:[#allocation2] sm:$0x1] %vm337_vm1, %v475_v4 }
  0xe2   : > { %v481_v5 = vld [vmem:[#allocation2] sm:$0x1] }
  0xe3   : > { %v482_v6 = vmax.f32 %v481_v5, 0.0 }
  0xe5   : > { %747 = vmatmul.mubr.msk.f32.vlgmr.msra.gmra.mrb[0].mxu0 %vm437_vm3, %v482_v6 }
 0x1b8   : > { %v560_v7 = vpop.f32.mrb[0].mxu0 }
 0x1b9   : > { %v712_v8 = vmul.f32 -1.442695, %v560_v7  ;;  %v748_v9 = vpop.f32.mrb[1].mxu0 }
 0x1bb   : > { %802 = vpow2.f32 %v712_v8 }
 0x1c5   : > { %v803_v10 = vpop.eup %802 }
 0x1c6   : > { %v567_v11 = vadd.f32 1.0, %v803_v10 }
 0x1c8   : > { %804 = vrcp.f32 %v567_v11 }
 0x1d2   : > { %v805_v12 = vpop.eup %804 }
 0x1d3   : > { %570 = vst [vmem:[#allocation3] sm:$0x1] %v805_v12 }
 0x1d4 PF: > { %p571_p7 = scmp.eq.s32.totalorder %s850_s15, 1 }
 0x1d5   : > { %v577_v14 = vld [vmem:[%s1063_s3] sm:$0xff] (%p571_p7)  ;;  %v578_v15 = vld [vmem:[%s1063_s3 + $0x8] sm:$0xff] (%p571_p7) }
 0x1d6   : > { %575 = sbr.rel (!%p571_p7) target bundleno = 478 (0x1de), region = 52 }
 0x1da   : > { %v714_v13 = vld [vmem:[#allocation3] ss:$0 sm:$0xff] (%p571_p7) }
 0x1db   : > { %v585_v16 = vmul.f32 (%p571_p7), %v714_v13, %v577_v14  ;;  %v586_v17 = vmul.f32 (%p571_p7), %v714_v13, %v578_v15 }
 0x1dd   : > { %587 = vst [vmem:[#allocation4] sm:$0xff] %v585_v16  ;;  %588 = vst [vmem:[#allocation4 + $0x8] sm:$0xff] %v586_v17 }
 0x1de PF: > { %p1026_p8 = scmp.eq.s32.totalorder %s700_s18, 1  ;;  %s863_s15 = smov [#allocation4]  }
 0x1df   : > { %s606_s5 = sshll.u32 %s863_s15, 4  ;;  %s607_s5 = int_to_ptr.vmem [resolvable:$true] %s606_s5 }
 0x1e0   : > { %s806_s6 = scalar_lea.vmem %s607_s5, 256  ;;  %s812_s7 = scalar_lea.vmem %s607_s5, 512 }
 0x1e1   : > { %p807_p9 = scmp.ne.s32.totalorder %s607_s5, %s806_s6  ;;  %p813_p12 = scmp.lt.s32.totalorder %s607_s5, %s607_s5 }
 0x1e2   : > { %p814_p13 = scmp.lt.s32.totalorder %s812_s7, %s806_s6 }
 0x1e3   : > { %p808_p10 = pnand %p807_p9, %p1026_p8 }
 0x1e4   : > { %p815_p0 = por %p814_p13, %p813_p12 }
 0x1e5   : > { %p809_p11 = pneg %p808_p10 }
 0x1e7   : > { %p816_p1 = pnand %p815_p0, %p809_p11 }
 0x1e9   : > { %819 = shalt.err (!%p816_p1)
}
 0x1ea   : > { %s820_s9 = scalar_lea.hbm %s1064_s4, 256 }
 0x1eb   : > { %p821_p2 = scmp.ne.s32.totalorder %s1064_s4, %s820_s9  ;;  %p826_p5 = scmp.lt.u32.totalorder %s820_s9, %s1064_s4 }
 0x1ed   : > { %p822_p3 = pnand %p821_p2, %p1026_p8 }
 0x1ef   : > { %p823_p4 = pneg %p822_p3 }
 0x1f1   : > { %p828_p6 = pnand %p826_p5, %p823_p4 }
 0x1f3   : > { %831 = shalt.err (!%p828_p6)
}
 0x1f4   : > { %s864_s14 = smov 128   ;;  %s865_s21 = smov 8  }
 0x1f5   : > { %762 = dma.vmem_to_hbm [thread:$0]  (%p1026_p8), %s607_s5, 256, %s1064_s4, [#allocation5], %s864_s14, %s864_s14, %s865_s21  }
 0x1f6 PF: > { %p770_p7 = scmp.ge.s32.totalorder %s858_s17, 2  ;;  %p771_p9 = scmp.eq.s32.totalorder %s701_s19, 1 }
 0x1f8   : > { %p766_p10 = pnand %p771_p9, %p770_p7 }
 0x1fa   : > { %845 = dma.done.wait (!%p766_p10), [#allocation5], 256  }
 0x1fb   : > { %847 = vsyncadd (!%p766_p10), [#allocation5], 4294967040  ;;  %s17_s17 = sadd.s32 1, %s858_s17   ;;  %s1066_s15 = smov %s854_s16 }
 0x1fc   : > { %p14_p11 = scmp.ge.s32.totalorder %s17_s17, 4   ;;  %s1067_s16 = smov %s1069_s20 }
 0x1fe   :  { %16 = sbr.rel (!%p14_p11) target bundleno = 3 (0x3), region = 93 }
 0x205   :  { %627 = vsyncpa [#allocation5], 1 }
 0x206   :  { %629 = vsyncpa [#allocation5 + $0x1], 1 }

</bundles_post_ra>
